<compile_context>
chip_gen: v7x
topology: tpu7x:2x2x1
jax: 0.10.0
libtpu: 0.0.40
codegen_flags: <defaults>
</compile_context>

<pallas_src>
import jax
import jax.numpy as jnp
from jax.experimental import pallas as pl
from jax.experimental.pallas import tpu as pltpu


def _cdiv(a, b):
    return (a + b - 1) // b


def _round_up(a, b):
    return ((a + b - 1) // b) * b


def film_kernel_folded(x_ref, w_ref, phase_ref, o_ref):
    # x_ref:    (tm, p*D_in)   packed input rows
    # w_ref:    (p*D_in, p*H)  per-batch weight with freq folded into columns
    # phase_ref:(1, p*H)       per-batch (freq*bias + phase), sublane-broadcast
    y = jnp.dot(x_ref[...], w_ref[...], preferred_element_type=jnp.float32)
    o_ref[...] = jnp.sin(y + phase_ref[...]).astype(o_ref.dtype)


def film_kernel(x_ref, w_ref, freq_ref, phase_ref, o_ref):
    # Fallback path (freq not folded into the weight).
    y = jnp.dot(x_ref[...], w_ref[...], preferred_element_type=jnp.float32)
    o_ref[...] = jnp.sin(freq_ref[...] * y + phase_ref[...]).astype(o_ref.dtype)


def film_layer(x, freq, phase_shift, weight, bias, *, tm=2048, out_dtype=None):
    """
    x:           (B, N, D_in)
    freq:        broadcastable to (B, 1, H)  (constant along N, as in the module)
    phase_shift: broadcastable to (B, 1, H)
    weight:      (D_in, H)   (transposed vs. torch nn.Linear storage)
    bias:        (H,)
    out_dtype:   optional narrower store dtype (e.g. jnp.bfloat16); default x.dtype
    returns:     (B, N, H)
    """
    B, N, D_in = x.shape
    D_w, H = weight.shape
    assert D_w == D_in, "weight must be (D_in, H)"
    out_dtype = x.dtype if out_dtype is None else out_dtype

    # Modulation must be constant along N (the module uses expand_as on (B,1,H)).
    for name, t in (("freq", freq), ("phase_shift", phase_shift)):
        if getattr(t, "ndim", 0) == 3:
            assert t.shape[1] == 1, f"{name} must be (B,1,H); per-row modulation unsupported"

    freq_b = jnp.broadcast_to(freq, (B, 1, H)).astype(jnp.float32)
    phase_b = jnp.broadcast_to(phase_shift, (B, 1, H)).astype(jnp.float32)
    # Fold bias into phase: sin(f*(xW + b) + p) == sin(f*(xW) + (f*b + p)).
    phase_b = freq_b * bias.reshape(1, 1, H).astype(jnp.float32) + phase_b

    # Lane-packing factor: fold p consecutive rows into the 128-lane dim so
    # stores are unmasked 128-lane vst and the sin polynomial uses all lanes.
    # Guarded so the (p*D_in, p*H) block-diagonal weight stays small.
    p = 1
    if H < 128 and 128 % H == 0:
        cand = 128 // H
        if (cand * D_in) * (cand * H) * 4 <= (1 << 20):  # <= 1 MiB resident weight
            p = cand
    pD, pH = p * D_in, p * H

    # Pad x only to a multiple of p (at most p-1 rows); no-op in the common case.
    x_p = x
    N_p = N
    if N % p != 0:
        N_p = _round_up(N, p)
        x_p = jnp.pad(x, ((0, 0), (0, N_p - N), (0, 0)))
    Np = N_p // p
    x_p = x_p.reshape(B, Np, pD)  # row-major: p consecutive rows -> lane dim

    # Row tile: as large as practical (long DMA bursts), sublane-aligned,
    # clamped so small inputs still produce >= 2 tiles (v7x megacore balance).
    tm_eff = min(tm, _round_up(Np, 8))
    if B * _cdiv(Np, tm_eff) < 2 and Np > 8:
        tm_eff = _round_up(_cdiv(Np, 2), 8)
    grid = (B, _cdiv(Np, tm_eff))  # ragged last row tile is clipped by Pallas

    if p > 1:
        # TODO(synk): w_eff depends only on static layer params; hoist/cache it across calls.
        w_eff = jnp.kron(jnp.eye(p, dtype=jnp.float32),
                         weight.astype(jnp.float32))          # (pD, pH) block-diagonal
        freq_p = jnp.tile(freq_b, (1, 1, p))                   # (B, 1, pH)
        phase_p = jnp.tile(phase_b, (1, 1, p))
    else:
        w_eff = weight.astype(jnp.float32)
        freq_p, phase_p = freq_b, phase_b

    # Fold freq into the per-batch weight columns when that stays small:
    # removes one VALU op per output element (v7x is VALU-bound on sin).
    fold_freq = (B * pD * pH * 4) <= (4 << 20)

    compiler_params = pltpu.CompilerParams(
        dimension_semantics=("parallel", "parallel"),
        vmem_limit_bytes=32 * 1024 * 1024,
    )

    if fold_freq:
        w_b = w_eff[None, :, :] * freq_p[:, 0][:, None, :]     # (B, pD, pH)
        out_p = pl.pallas_call(
            film_kernel_folded,
            out_shape=jax.ShapeDtypeStruct((B, Np, pH), out_dtype),
            grid_spec=pltpu.PrefetchScalarGridSpec(
                num_scalar_prefetch=0,
                grid=grid,
                in_specs=[
                    pl.BlockSpec((None, tm_eff, pD), lambda b, i: (b, i, 0)),
                    pl.BlockSpec((None, pD, pH), lambda b, i: (b, 0, 0)),
                    pl.BlockSpec((None, 1, pH), lambda b, i: (b, 0, 0)),
                ],
                out_specs=pl.BlockSpec((None, tm_eff, pH), lambda b, i: (b, i, 0)),
            ),
            compiler_params=compiler_params,
        )(x_p, w_b, phase_p)
    else:
        out_p = pl.pallas_call(
            film_kernel,
            out_shape=jax.ShapeDtypeStruct((B, Np, pH), out_dtype),
            grid_spec=pltpu.PrefetchScalarGridSpec(
                num_scalar_prefetch=0,
                grid=grid,
                in_specs=[
                    pl.BlockSpec((None, tm_eff, pD), lambda b, i: (b, i, 0)),
                    pl.BlockSpec((pD, pH), lambda b, i: (0, 0)),
                    pl.BlockSpec((None, 1, pH), lambda b, i: (b, 0, 0)),
                    pl.BlockSpec((None, 1, pH), lambda b, i: (b, 0, 0)),
                ],
                out_specs=pl.BlockSpec((None, tm_eff, pH), lambda b, i: (b, i, 0)),
            ),
            compiler_params=compiler_params,
        )(x_p, w_eff, freq_p, phase_p)

    out = out_p.reshape(B, Np * p, H)
    if Np * p != N:
        out = out[:, :N, :]
    return out


if __name__ == "__main__":
    # Small shapes consistent with the module's forward.
    B, N, D_in, H = 2, 64, 32, 32

    key = jax.random.PRNGKey(0)
    kx, kf, kp, kw, kb = jax.random.split(key, 5)

    x = jax.random.normal(kx, (B, N, D_in), dtype=jnp.float32)
    freq = jax.random.normal(kf, (B, 1, H), dtype=jnp.float32) * 30.0
    phase_shift = jax.random.normal(kp, (B, 1, H), dtype=jnp.float32)

    # Deterministic nn.Linear-style params (uniform(-1/sqrt(D_in), 1/sqrt(D_in))).
    bound = 1.0 / jnp.sqrt(jnp.float32(D_in))
    weight = jax.random.uniform(kw, (D_in, H), minval=-bound, maxval=bound,
                                dtype=jnp.float32)
    bias = jax.random.uniform(kb, (H,), minval=-bound, maxval=bound,
                              dtype=jnp.float32)

    out = film_layer(x, freq, phase_shift, weight, bias)
    out = jax.block_until_ready(out)

    # Reference check (plain JAX, module semantics).
    ref = jnp.sin(freq * (jnp.einsum("bnd,dh->bnh", x, weight) + bias)
                  + phase_shift)
    assert out.shape == (B, N, H)
    err = float(jnp.max(jnp.abs(out - ref)))
    assert jnp.allclose(out, ref, atol=1e-3, rtol=1e-3), err

    print("KERNEL_OK")
</pallas_src>

<mosaic_0001>
module attributes {stable_mosaic.version = 11 : i64} {
  func.func @film_kernel_folded(%arg0: i32, %arg1: i32, %arg2: memref<1x16x128xf32, #tpu.memory_space<vmem>>, %arg3: memref<1x128x128xf32, #tpu.memory_space<vmem>>, %arg4: memref<1x1x128xf32, #tpu.memory_space<vmem>>, %arg5: memref<1x16x128xf32, #tpu.memory_space<vmem>>) attributes {dimension_semantics = [#tpu.dimension_semantics<parallel>, #tpu.dimension_semantics<parallel>], iteration_bounds = array<i64: 2, 1>, scalar_prefetch = 0 : i64, scratch_operands = 0 : i64, tpu.core_type = #tpu.core_type<tc>, window_params = [{transform_indices = @transform_0, window_bounds = array<i64: 1, 16, 128>}, {transform_indices = @transform_1, window_bounds = array<i64: 1, 128, 128>}, {transform_indices = @transform_2, window_bounds = array<i64: 1, 1, 128>}, {transform_indices = @transform_3, window_bounds = array<i64: 1, 16, 128>}]} {
    %c0 = arith.constant 0 : index
    %c0_0 = arith.constant 0 : index
    %c0_1 = arith.constant 0 : index
    %0 = vector.load %arg2[%c0, %c0_0, %c0_1] : memref<1x16x128xf32, #tpu.memory_space<vmem>>, vector<1x16x128xf32>
    %1 = vector.shape_cast %0 : vector<1x16x128xf32> to vector<16x128xf32>
    %c0_2 = arith.constant 0 : index
    %c0_3 = arith.constant 0 : index
    %c0_4 = arith.constant 0 : index
    %2 = vector.load %arg3[%c0_2, %c0_3, %c0_4] : memref<1x128x128xf32, #tpu.memory_space<vmem>>, vector<1x128x128xf32>
    %3 = vector.shape_cast %2 : vector<1x128x128xf32> to vector<128x128xf32>
    %cst = arith.constant dense<0.000000e+00> : vector<16x128xf32>
    %4 = tpu.matmul %1, %3, %cst {dimension_numbers = #tpu.dot_dimension_numbers<[1], [0], [0], [1], [0, 0, 1, 1], [], []>} : vector<16x128xf32>, vector<128x128xf32>, vector<16x128xf32> -> vector<16x128xf32>
    %c0_5 = arith.constant 0 : index
    %c0_6 = arith.constant 0 : index
    %c0_7 = arith.constant 0 : index
    %5 = vector.load %arg4[%c0_5, %c0_6, %c0_7] : memref<1x1x128xf32, #tpu.memory_space<vmem>>, vector<1x1x128xf32>
    %6 = vector.shape_cast %5 : vector<1x1x128xf32> to vector<1x128xf32>
    %7 = vector.broadcast %6 : vector<1x128xf32> to vector<16x128xf32>
    %8 = arith.addf %4, %7 : vector<16x128xf32>
    %9 = math.sin %8 : vector<16x128xf32>
    %c0_8 = arith.constant 0 : index
    %c0_9 = arith.constant 0 : index
    %c0_10 = arith.constant 0 : index
    %10 = vector.load %arg5[%c0_8, %c0_9, %c0_10] : memref<1x16x128xf32, #tpu.memory_space<vmem>>, vector<1x16x128xf32>
    %11 = vector.shape_cast %10 : vector<1x16x128xf32> to vector<16x128xf32>
    %12 = vector.shape_cast %9 : vector<16x128xf32> to vector<1x16x128xf32>
    tpu.vector_store %arg5[%c0_8, %c0_9, %c0_10], %12 {strides = array<i32>} : memref<1x16x128xf32, #tpu.memory_space<vmem>>, vector<1x16x128xf32>,
    return
  }
  func.func @transform_0(%arg0: i32, %arg1: i32) -> (i32, i32, i32) {
    %c0_i32 = arith.constant 0 : i32
    %c0_i32_0 = arith.constant 0 : i32
    return %arg0, %arg1, %c0_i32 : i32, i32, i32
  }
  func.func @transform_1(%arg0: i32, %arg1: i32) -> (i32, i32, i32) {
    %c0_i32 = arith.constant 0 : i32
    %c0_i32_0 = arith.constant 0 : i32
    %c0_i32_1 = arith.constant 0 : i32
    return %arg0, %c0_i32, %c0_i32_0 : i32, i32, i32
  }
  func.func @transform_2(%arg0: i32, %arg1: i32) -> (i32, i32, i32) {
    %c0_i32 = arith.constant 0 : i32
    %c0_i32_0 = arith.constant 0 : i32
    %c0_i32_1 = arith.constant 0 : i32
    return %arg0, %c0_i32, %c0_i32_0 : i32, i32, i32
  }
  func.func @transform_3(%arg0: i32, %arg1: i32) -> (i32, i32, i32) {
    %c0_i32 = arith.constant 0 : i32
    %c0_i32_0 = arith.constant 0 : i32
    return %arg0, %arg1, %c0_i32 : i32, i32, i32
  }
}

</mosaic_0001>

<bundles_post_ra>
// kernel: tpu_custom_call.1
= control target key start
LH: loop header
LB: loop body
LE: loop exit
PB: predicated region body
PF: predicated region fallthrough
CT: control target
= control target key end

     0   :  { %8 = vsyncpa [#allocation3], 0  ;;  %s1422_s0 = inlined_call_operand.hbm [shape: f32[2,16,128], index: 0, kind: input, shape index: {}]   ;;  %s1423_s1 = inlined_call_operand.hbm [shape: f32[2,128,128], index: 1, kind: input, shape index: {}]   ;;  %s1424_s2 = inlined_call_operand.vmem [shape: f32[2,1,128], index: 2, kind: input, shape index: {}]   ;;  %s1425_s3 = inlined_call_operand.hbm [shape: f32[2,16,128], index: 3, kind: output, shape index: {}]  }
   0x1   :  { %10 = vsyncpa [#allocation3 + $0x1], 0 }
   0x2   :  { %11 = vsyncpa [#allocation6], 0 }
   0x3   :  { %13 = vsyncpa [#allocation6 + $0x1], 0 }
   0x4   :  { %14 = vsyncpa [#allocation4], 0 }
   0x5   :  { %16 = vsyncpa [#allocation4 + $0x1], 0  ;;  %s1098_s12 = smov 0   ;;  %s1100_s13 = smov 0  }
   0x6   :  { %s1102_s14 = smov 0   ;;  %s1104_s15 = smov 0  }
   0x7   :  { %s1106_s16 = smov 0   ;;  %s1108_s17 = smov 0  }
   0x8 LB: > { %s708_s18 = sadd.s32 4294967295, %s1063_s17   ;;  %s709_s19 = sadd.s32 4294967294, %s1063_s17   ;;  %s1063_s17 = sphi %s1108_s17, %s22_s17   ;;  %s1059_s16 = sphi %s1106_s16, %s1443_s16   ;;  %s1055_s15 = sphi %s1104_s15, %s1442_s15   ;;  %s1051_s14 = sphi %s1102_s14, %s1441_s14   ;;  %s1047_s13 = sphi %s1100_s13, %s1440_s13   ;;  %s1043_s12 = sphi %s1098_s12, %s1439_s12  }
   0x9   : > { %s34_s20 = sadd.s32 1, %s1059_s16  ;;  %s43_s21 = sadd.s32 1, %s1051_s14 }
   0xa   : > { %p36_p0 = scmp.ge.s32.totalorder %s34_s20, 2  ;;  %p50_p1 = scmp.ne.s32.totalorder %s1051_s14, %s1047_s13 }
   0xb   : > { %p51_p2 = scmp.eq.s32.totalorder %s1063_s17, 0  ;;  %p56_p3 = scmp.ne.s32.totalorder %s1047_s13, %s1043_s12 }
   0xc   : > { %s1445_s20 = smov (%p36_p0, %s34_s20), 0  ;;  %p57_p5 = scmp.eq.s32.totalorder %s708_s18, 0 }
   0xd   : > { %p1139_p4 = por %p51_p2, %p50_p1  ;;  %s38_s23 = ssub.s32 %s1059_s16, %s1445_s20 }
   0xe   : > { %p134_p6 = scmp.eq.s32.totalorder %s708_s18, 1  ;;  %p41_p7 = scmp.eq.s32.totalorder %s38_s23, 0 }
   0xf   : > { %p1145_p8 = por %p57_p5, %p56_p3  ;;  %p140_p10 = scmp.eq.s32.totalorder %s709_s19, 1 }
  0x10   : > { %p1149_p9 = por %p134_p6, %p50_p1  ;;  %p849_p13 = scmp.lt.s32.totalorder %s1063_s17, 2 }
  0x11   : > { %s1429_s24 = scalar_select %p1145_p8, 1, 0 }
  0x12   : > { %s1430_s25 = scalar_select %p1149_p9, 1, 0 }
  0x13   : > { %s1154_s26 = scalar_select %p41_p7, %s1051_s14, %s43_s21  }
  0x14   : > { %p1156_p11 = por %p140_p10, %p56_p3  ;;  %s1163_s28 = sand.u32 1, %s1051_s14  }
  0x15   : > { %s712_s29 = sshll.u32 %s1163_s28, 4  ;;  %s736_s30 = sshll.u32 %s1059_s16, 8 }
  0x16   : > { %s1431_s27 = scalar_select %p1156_p11, 1, 0 }
  0x17   : > { %s1170_s6 = scalar_lea.hbm %s1422_s0, %s736_s30  ;;  %s164_s7 = scalar_lea.vmem [#allocation2], %s712_s29 }
  0x18   : > { %s173_s8 = sshll.u32 %s164_s7, 4  ;;  %p1176_p0 = pnand %p849_p13, %p1139_p4  ;;  %s1172_s8 = int_to_ptr.vmem [resolvable:$true] %s173_s8 }
  0x19   : > { %s161_s10 = scalar_lea.sflag [#allocation3], %s1163_s28  ;;  %s917_s11 = scalar_lea.hbm %s1170_s6, 256 }
  0x1a   : > { %p918_p2 = scmp.ne.s32.totalorder %s1170_s6, %s917_s11  ;;  %p919_p3 = pneg %p1176_p0 }
  0x1b   : > { %s922_s21 = scalar_lea.hbm %s1422_s0, 512  ;;  %p923_p4 = scmp.lt.u32.totalorder %s1170_s6, %s1422_s0 }
  0x1c   : > { %p920_p5 = pnand %p919_p3, %p918_p2  ;;  %p924_p7 = scmp.lt.u32.totalorder %s922_s21, %s917_s11 }
  0x1d   : > { %p926_p13 = scmp.lt.u32.totalorder %s917_s11, %s1170_s6 }
  0x1e   : > { %p921_p6 = pneg %p920_p5  ;;  %p925_p10 = por %p924_p7, %p923_p4 }
  0x20   : > { %p927_p12 = por %p926_p13, %p925_p10 }
  0x22   : > { %p928_p1 = pnand %p927_p12, %p921_p6 }
  0x24   : > { %931 = shalt.err (!%p928_p1)
}
  0x25   : > { %s932_s29 = scalar_lea.vmem %s1172_s8, 256  ;;  %s1065_s30 = smov [#allocation2]  }
  0x26   : > { %p933_p2 = scmp.ne.s32.totalorder %s1172_s8, %s932_s29  ;;  %s937_s4 = sshll.u32 %s1065_s30, 4  ;;  %s938_s4 = int_to_ptr.vmem [resolvable:$false] %s937_s4 }
  0x27   : > { %s939_s5 = scalar_lea.vmem %s938_s4, 512  ;;  %p940_p9 = scmp.lt.s32.totalorder %s1172_s8, %s938_s4 }
  0x28   : > { %p935_p5 = pnand %p933_p2, %p919_p3  ;;  %p941_p4 = scmp.lt.s32.totalorder %s939_s5, %s932_s29 }
  0x2a   : > { %p936_p11 = pneg %p935_p5  ;;  %p942_p7 = por %p941_p4, %p940_p9 }
  0x2c   : > { %p943_p10 = pnand %p942_p7, %p936_p11 }
  0x2e   : > { %946 = shalt.err (!%p943_p10)
}
  0x2f   : > { %s1066_s7 = smov 128   ;;  %s1067_s11 = smov 8  }
  0x30   : > { %841 = dma.hbm_to_vmem [thread:$0]  (!%p1176_p0), %s1170_s6, 256, %s1172_s8, %s161_s10, %s1066_s7, %s1066_s7, %s1067_s11  }
  0x31   : > { %p208_p9 = scmp.lt.s32.totalorder %s1063_s17, 3  ;;  %s715_s18 = sshll.u32 %s1163_s28, 7 }
  0x32   : > { %s737_s19 = sshll.u32 %s1059_s16, 11  ;;  %p1433_p11 = scmp.ge.s32.totalorder %s1063_s17, 1 }
  0x33   : > { %s1224_s29 = scalar_lea.hbm %s1423_s1, %s737_s19  ;;  %s187_s30 = scalar_lea.vmem [#allocation5], %s715_s18 }
  0x34   : > { %p1217_p12 = pnand %p1433_p11, %p208_p9  ;;  %s194_s4 = sshll.u32 %s187_s30, 4  ;;  %s1226_s4 = int_to_ptr.vmem [resolvable:$true] %s194_s4 }
  0x35   : > { %s184_s6 = scalar_lea.sflag [#allocation6], %s1163_s28  ;;  %s947_s8 = scalar_lea.hbm %s1224_s29, 2048 }
  0x36   : > { %p948_p1 = scmp.ne.s32.totalorder %s1224_s29, %s947_s8  ;;  %s952_s19 = scalar_lea.hbm %s1423_s1, 4096 }
  0x37   : > { %p953_p2 = scmp.lt.u32.totalorder %s1224_s29, %s1423_s1  ;;  %p954_p5 = scmp.lt.u32.totalorder %s952_s19, %s947_s8 }
  0x38   : > { %p950_p6 = pnand %p948_p1, %p919_p3  ;;  %p956_p7 = scmp.lt.u32.totalorder %s947_s8, %s1224_s29 }
  0x39   : > { %p955_p4 = por %p954_p5, %p953_p2 }
  0x3a   : > { %p951_p13 = pneg %p950_p6 }
  0x3b   : > { %p957_p10 = por %p956_p7, %p955_p4 }
  0x3d   : > { %p958_p9 = pnand %p957_p10, %p951_p13 }
  0x3f   : > { %961 = shalt.err (!%p958_p9)
}
  0x40   : > { %s962_s18 = scalar_lea.vmem %s1226_s4, 2048  ;;  %s1068_s30 = smov [#allocation5]  }
  0x41   : > { %p963_p11 = scmp.ne.s32.totalorder %s1226_s4, %s962_s18  ;;  %s967_s10 = sshll.u32 %s1068_s30, 4  ;;  %s968_s10 = int_to_ptr.vmem [resolvable:$false] %s967_s10 }
  0x42   : > { %s969_s5 = scalar_lea.vmem %s968_s10, 4096  ;;  %p970_p8 = scmp.lt.s32.totalorder %s1226_s4, %s968_s10 }
  0x43   : > { %p965_p1 = pnand %p963_p11, %p919_p3  ;;  %p971_p2 = scmp.lt.s32.totalorder %s969_s5, %s962_s18 }
  0x45   : > { %p966_p6 = pneg %p965_p1  ;;  %p972_p5 = por %p971_p2, %p970_p8 }
  0x47   : > { %p973_p4 = pnand %p972_p5, %p966_p6 }
  0x49   : > { %976 = shalt.err (!%p973_p4)
}
  0x4a   : > { %844 = dma.hbm_to_vmem [thread:$0]  (!%p1176_p0), %s1224_s29, 2048, %s1226_s4, %s184_s6, %s1066_s7, %s1066_s7, %s1067_s11  }
  0x4b   : > { %212 = sbr.rel (%p1217_p12) target bundleno = 439 (0x1b7), region = 32  ;;  %s1260_s8 = sand.u32 (!%p1217_p12), 1, %s1047_s13  }
  0x4c   : > { %s719_s19 = sshll.u32 (!%p1217_p12), %s1260_s8, 4  ;;  %s215_s9 = scalar_lea.sflag (!%p1217_p12), [#allocation3], %s1260_s8 }
  0x4d   : > { %s1266_s22 = scalar_lea.vmem (!%p1217_p12), [#allocation2], %s719_s19  ;;  %p1435_p8 = scmp.ne.s32.totalorder (!%p1217_p12), %s1429_s24, 0 }
  0x52   : > { %1030 = dma.done.wait (%p1435_p8), %s215_s9, 256  }
  0x53   : > { %1032 = vsyncadd (%p1435_p8), %s215_s9, 4294967040  ;;  %s720_s28 = sshll.u32 %s1260_s8, 7  ;;  %s224_s7 = scalar_lea.sflag [#allocation6], %s1260_s8 }
  0x54   : > { %s1274_s11 = scalar_lea.vmem [#allocation5], %s720_s28 }
  0x55   : > { %1034 = dma.done.wait (%p1435_p8), %s224_s7, 2048  }
  0x56   : > { %1036 = vsyncadd (%p1435_p8), %s224_s7, 4294965248  ;;  %v265_v0 = vld [vmem:[%s1274_s11] sm:$0xff]  ;;  %v266_v1 = vld [vmem:[%s1274_s11 + $0x8] sm:$0xff]  ;;  %p259_p0 = scmp.lt.s32.totalorder %s1055_s15, 1  ;;  %v1069_v51 = vmov 683565275  }
  0x57   : > { %v267_v2 = vld [vmem:[%s1274_s11 + $0x10] sm:$0xff]  ;;  %v792_v3 = vpack.c.bf16 %v266_v1, %v265_v0  ;;  %v268_v4 = vld [vmem:[%s1274_s11 + $0x18] sm:$0xff]  ;;  %v269_v6 = vld [vmem:[%s1274_s11 + $0x20] sm:$0xff]  ;;  %v1070_v55 = vmov 2475754826   ;;  %s257_s6 = scalar_lea.vmem [#allocation7], %s719_s19 }
  0x58   : > { %v796_v5 = vpack.c.bf16 %v268_v4, %v267_v2  ;;  %v270_v7 = vld [vmem:[%s1274_s11 + $0x28] sm:$0xff]  ;;  %v263_v9 = vld [vmem:[%s1266_s22] sm:$0xff]  ;;  %v272_v11 = vld [vmem:[%s1274_s11 + $0x38] sm:$0xff]  ;;  %s260_s24 = scalar_select %p259_p0, %s1055_s15, 1  ;;  %v1071_v57 = vmov 2131351028  }
  0x59   : > { %793 = vmatprep.subr.bf16.mxu0 %v792_v3  ;;  %v800_v8 = vpack.c.bf16 %v270_v7, %v269_v6  ;;  %v271_v10 = vld [vmem:[%s1274_s11 + $0x30] sm:$0xff]  ;;  %789 = vmatprep.mubr.f32.mxu0 %v263_v9  ;;  %v273_v13 = vld [vmem:[%s1274_s11 + $0x40] sm:$0xff]  ;;  %v274_v14 = vld [vmem:[%s1274_s11 + $0x48] sm:$0xff]  ;;  %v1072_v59 = vmov 2102212464   ;;  %s738_s23 = sshll.u32 %s1055_s15, 8 }
  0x5a   : > { %795 = vmatpush3.bf16.msra.mxu0 %v792_v3  ;;  %v804_v12 = vpack.c.bf16 %v272_v11, %v271_v10  ;;  %v808_v15 = vpack.c.bf16 %v274_v14, %v273_v13  ;;  %v275_v16 = vld [vmem:[%s1274_s11 + $0x50] sm:$0xff]  ;;  %v276_v17 = vld [vmem:[%s1274_s11 + $0x58] sm:$0xff]  ;;  %v277_v19 = vld [vmem:[%s1274_s11 + $0x60] sm:$0xff]  ;;  %s261_s4 = scalar_lea.vmem %s1424_s2, %s260_s24  ;;  %v1073_v61 = vmov 920167782   ;;  %s589_s18 = sshll.u32 %s257_s6, 4  ;;  %s1372_s18 = int_to_ptr.vmem [resolvable:$true] %s589_s18 }
  0x5b   : > { %797 = vmatprep.subr.bf16.mxu0 %v796_v5  ;;  %v812_v18 = vpack.c.bf16 %v276_v17, %v275_v16  ;;  %v278_v20 = vld [vmem:[%s1274_s11 + $0x68] sm:$0xff]  ;;  %v279_v22 = vld [vmem:[%s1274_s11 + $0x70] sm:$0xff]  ;;  %v280_v23 = vld [vmem:[%s1274_s11 + $0x78] sm:$0xff]  ;;  %v1074_v4 = vmov 1326507024   ;;  %s1370_s5 = scalar_lea.hbm %s1425_s3, %s738_s23  ;;  %s574_s15 = scalar_lea.sflag [#allocation4], %s1260_s8 }
  0x5c   : > { %v816_v21 = vpack.c.bf16 %v278_v20, %v277_v19  ;;  %v820_v24 = vpack.c.bf16 %v280_v23, %v279_v22  ;;  %v264_v25 = vld [vmem:[%s1266_s22 + $0x8] sm:$0xff]  ;;  %v722_v26 = vld [vmem:[%s261_s4] ss:$0 sm:$0xff]  ;;  %s977_s19 = scalar_lea.vmem %s1372_s18, 256  ;;  %p1436_p12 = scmp.ne.s32.totalorder %s1430_s25, 0 }
  0x5d   : > { %p978_p3 = scmp.ne.s32.totalorder %s1372_s18, %s977_s19  ;;  %s1075_s9 = smov [#allocation7]  }
  0x5e   : > { %799 = vmatpush3.bf16.msra.mxu0 %v796_v5  ;;  %s981_s22 = sshll.u32 %s1075_s9, 4  ;;  %s982_s22 = int_to_ptr.vmem [resolvable:$false] %s981_s22 }
  0x5f   : > { %801 = vmatprep.subr.bf16.mxu0 %v800_v8  ;;  %p979_p13 = pnand %p978_p3, %p1436_p12  ;;  %s983_s28 = scalar_lea.vmem %s982_s22, 512 }
  0x60   : > { %p984_p10 = scmp.lt.s32.totalorder %s1372_s18, %s982_s22  ;;  %p985_p9 = scmp.lt.s32.totalorder %s983_s28, %s977_s19 }
  0x61   : > { %p980_p7 = pneg %p979_p13 }
  0x62   : > { %803 = vmatpush3.bf16.msra.mxu0 %v800_v8  ;;  %p986_p11 = por %p985_p9, %p984_p10 }
  0x63   : > { %805 = vmatprep.subr.bf16.mxu0 %v804_v12 }
  0x64   : > { %p987_p1 = pnand %p986_p11, %p980_p7 }
  0x66   : > { %807 = vmatpush3.bf16.msra.mxu0 %v804_v12 }
  0x67   : > { %809 = vmatprep.subr.bf16.mxu0 %v808_v15 }
  0x6a   : > { %811 = vmatpush3.bf16.msra.mxu0 %v808_v15 }
  0x6b   : > { %813 = vmatprep.subr.bf16.mxu0 %v812_v18 }
  0x6e   : > { %815 = vmatpush3.bf16.msra.mxu0 %v812_v18 }
  0x6f   : > { %817 = vmatprep.subr.bf16.mxu0 %v816_v21 }
  0x72   : > { %819 = vmatpush3.bf16.msra.mxu0 %v816_v21 }
  0x73   : > { %821 = vmatprep.subr.bf16.mxu0 %v820_v24 }
  0x76   : > { %823 = vmatpush3.bf16.msra.mxu0 %v820_v24 }
  0x79   : > { %790 = vmatmul.mubr.f32.vlgmr.msra.gmra.mrb[0].mxu0 %v264_v25 }
 0x14c   : > { %v791_v27 = vpop.f32.mrb[0].mxu0 }
 0x14d   : > { %v1303_v28 = vadd.f32 %v791_v27, %v722_v26  ;;  %v354_v29 = vpop.f32.mrb[1].mxu0 }
 0x14e   : > { %v1305_v30 = vadd.f32 %v722_v26, %v354_v29 }
 0x14f   : > { %v467_v31 = vand.u32 2147483647, %v1303_v28  ;;  %v470_v32 = vand.u32 2139095040, %v1303_v28  ;;  %vm469_vm14 = vcmp.lt.s32.totalorder %v1303_v28, 0 }
 0x150   : > { %v366_v33 = vand.u32 2139095040, %v1305_v30  ;;  %v363_v36 = vand.u32 2147483647, %v1305_v30 }
 0x151   : > { %v471_v34 = vshrl.u32 %v470_v32, 23  ;;  %v474_v35 = vand.u32 8388607, %v467_v31  ;;  %vm468_vm15 = vcmp.le.f32.partialorder %v467_v31, 0.7853982 }
 0x152   : > { %v367_v37 = vshrl.u32 %v366_v33, 23  ;;  %v1315_v42 = vand.u32 8388607, %v363_v36 }
 0x153   : > { %v727_v38 = vadd.s32 4294967169, %v471_v34  ;;  %v475_v41 = vor.u32 8388608, %v474_v35 }
 0x154   : > { %v723_v39 = vadd.s32 4294967169, %v367_v37  ;;  %v371_v49 = vor.u32 8388608, %v1315_v42 }
 0x155   : > { %v477_v40 = vadd.s32 1, %v727_v38  ;;  %v1317_v48 = vshll.u32 %v475_v41, 8 }
 0x156   : > { %v373_v43 = vadd.s32 1, %v723_v39 }
 0x157   : > { %vm478_vm0 = vcmp.gt.s32.totalorder %v477_v40, 0 }
 0x158   : > { %v479_v44 = vsel %vm478_vm0, %v477_v40, 0  ;;  %vm374_vm1 = vcmp.gt.s32.totalorder %v373_v43, 0  ;;  %vm365_vm0 = vcmp.lt.s32.totalorder %v1305_v30, 0 }
 0x159   : > { %v480_v45 = vshrl.u32 %v479_v44, 5  ;;  %v481_v46 = vand.u32 31, %v479_v44  ;;  %v375_v47 = vsel %vm374_vm1, %v373_v43, 0  ;;  %v411_v43 = vshll.u32 %v371_v49, 8 }
 0x15a   : > { %v1320_v53 = vshrl.u32 %v375_v47, 5  ;;  %v377_v54 = vand.u32 31, %v375_v47  ;;  %vm364_vm1 = vcmp.le.f32.partialorder %v363_v36, 0.7853982 }
 0x15b   : > { %v482_v50 = vsub.s32 32, %v481_v46  ;;  %v484_v52 = vshll.u32 %v1069_v51, %v481_v46  ;;  %v487_v56 = vshll.u32 %v1070_v55, %v481_v46  ;;  %v490_v58 = vshll.u32 %v1071_v57, %v481_v46 }
 0x15c   : > { %v493_v60 = vshll.u32 %v1072_v59, %v481_v46  ;;  %v496_v62 = vshll.u32 %v1073_v61, %v481_v46  ;;  %vm499_vm2 = vcmp.lt.s32.totalorder %v480_v45, 1  ;;  %vm500_vm3 = vcmp.lt.s32.totalorder %v480_v45, 2 }
 0x15d   : > { %v485_v63 = vshrl.u32 %v1070_v55, %v482_v50  ;;  %v488_v0 = vshrl.u32 %v1071_v57, %v482_v50  ;;  %v491_v1 = vshrl.u32 %v1072_v59, %v482_v50  ;;  %v483_v2 = vshrl.u32 %v1069_v51, %v482_v50 }
 0x15e   : > { %v494_v3 = vshrl.u32 %v1073_v61, %v482_v50  ;;  %v497_v5 = vshrl.u32 %v1074_v4, %v482_v50  ;;  %v378_v9 = vsub.s32 32, %v377_v54  ;;  %vm501_vm4 = vcmp.lt.s32.totalorder %v480_v45, 3 }
 0x15f   : > { %v486_v6 = vor.u32 %v485_v63, %v484_v52  ;;  %v489_v7 = vor.u32 %v488_v0, %v487_v56  ;;  %v492_v8 = vor.u32 %v491_v1, %v490_v58  ;;  %vm502_vm5 = vcmp.lt.s32.totalorder %v480_v45, 4 }
 0x160   : > { %v495_v10 = vor.u32 %v494_v3, %v493_v60  ;;  %v498_v11 = vor.u32 %v497_v5, %v496_v62  ;;  %v380_v19 = vshll.u32 %v1069_v51, %v377_v54  ;;  %v381_v22 = vshrl.u32 %v1070_v55, %v378_v9 }
 0x161   : > { %v503_v12 = vsel %vm499_vm2, %v483_v2, %v486_v6  ;;  %v504_v13 = vsel %vm502_vm5, %v492_v8, 2102212464  ;;  %v507_v14 = vsel %vm499_vm2, %v486_v6, %v489_v7  ;;  %v511_v15 = vsel %vm499_vm2, %v489_v7, %v492_v8 }
 0x162   : > { %v505_v16 = vsel %vm501_vm4, %v489_v7, %v504_v13  ;;  %v508_v17 = vsel %vm502_vm5, %v495_v10, 920167782  ;;  %v512_v18 = vsel %vm502_vm5, %v498_v11, 1326507024  ;;  %v383_v23 = vshll.u32 %v1070_v55, %v377_v54 }
 0x163   : > { %v509_v20 = vsel %vm501_vm4, %v492_v8, %v508_v17  ;;  %v513_v21 = vsel %vm501_vm4, %v495_v10, %v512_v18  ;;  %v506_v24 = vsel %vm500_vm3, %v503_v12, %v505_v16  ;;  %v384_v27 = vshrl.u32 %v1071_v57, %v378_v9 }
 0x164   : > { %v510_v25 = vsel %vm500_vm3, %v507_v14, %v509_v20  ;;  %v514_v26 = vsel %vm500_vm3, %v511_v15, %v513_v21  ;;  %v382_v35 = vor.u32 %v381_v22, %v380_v19  ;;  %v386_v38 = vshll.u32 %v1071_v57, %v377_v54 }
 0x165   : > { %v1329_v29 = vmul.u32.u64.low %v1317_v48, %v514_v26  ;;  %v1330_v32 = vmul.u32.u64.high %v1317_v48, %v514_v26, %v1329_v29  ;;  %v1333_v33 = vmul.u32.u64.low %v1317_v48, %v510_v25  ;;  %v1334_v34 = vmul.u32.u64.high %v1317_v48, %v510_v25, %v1333_v33 }
 0x166   : > { %v385_v37 = vor.u32 %v384_v27, %v383_v23  ;;  %v387_v39 = vshrl.u32 %v1072_v59, %v378_v9  ;;  %v389_v40 = vshll.u32 %v1072_v59, %v377_v54  ;;  %v390_v41 = vshrl.u32 %v1073_v61, %v378_v9 }
 0x167   : > { %v393_v42 = vshrl.u32 %v1074_v4, %v378_v9  ;;  %v522_v44 = vmul.u32 %v1317_v48, %v506_v24  ;;  %v379_v45 = vshrl.u32 %v1069_v51, %v378_v9  ;;  %v392_v47 = vshll.u32 %v1073_v61, %v377_v54 }
 0x168   : > { %v388_v46 = vor.u32 %v387_v39, %v386_v38  ;;  %vm524_vm6 = vc.u32 %v1330_v32, %v1333_v33  ;;  %v525_v50 = vadd.s32 1, %v1334_v34  ;;  %v391_v52 = vor.u32 %v390_v41, %v389_v40 }
 0x169   : > { %vm395_vm7 = vcmp.lt.s32.totalorder %v1320_v53, 1  ;;  %v394_v55 = vor.u32 %v393_v42, %v392_v47  ;;  %vm397_vm8 = vcmp.lt.s32.totalorder %v1320_v53, 3  ;;  %vm398_vm9 = vcmp.lt.s32.totalorder %v1320_v53, 4 }
 0x16a   : > { %v403_v56 = vsel %vm395_vm7, %v382_v35, %v385_v37  ;;  %v526_v49 = vsel %vm524_vm6, %v525_v50, %v1334_v34  ;;  %v400_v57 = vsel %vm398_vm9, %v388_v46, 2102212464  ;;  %v404_v48 = vsel %vm398_vm9, %v391_v52, 920167782 }
 0x16b   : > { %v407_v51 = vsel %vm395_vm7, %v385_v37, %v388_v46  ;;  %v527_v58 = vadd.s32 %v526_v49, %v522_v44  ;;  %vm396_vm10 = vcmp.lt.s32.totalorder %v1320_v53, 2  ;;  %v405_v54 = vsel %vm397_vm8, %v388_v46, %v404_v48 }
 0x16c   : > { %v408_v59 = vsel %vm398_vm9, %v394_v55, 1326507024  ;;  %v399_v60 = vsel %vm395_vm7, %v379_v45, %v382_v35  ;;  %v401_v61 = vsel %vm397_vm8, %v385_v37, %v400_v57  ;;  %v406_v62 = vsel %vm396_vm10, %v403_v56, %v405_v54 }
 0x16d   : > { %v409_v63 = vsel %vm397_vm8, %v391_v52, %v408_v59  ;;  %v528_v0 = vadd.s32 536870912, %v527_v58  ;;  %v1344_v2 = vmul.u32.u64.low %v411_v43, %v406_v62  ;;  %v1345_v3 = vmul.u32.u64.high %v411_v43, %v406_v62, %v1344_v2 }
 0x16e   : > { %v410_v1 = vsel %vm396_vm10, %v407_v51, %v409_v63  ;;  %v402_v7 = vsel %vm396_vm10, %v399_v60, %v401_v61  ;;  %v523_v23 = vadd.s32 %v1333_v33, %v1330_v32  ;;  %vm559_vm5 = vweird.f32 %v1303_v28 }
 0x16f   : > { %v1347_v4 = vmul.u32.u64.low %v411_v43, %v410_v1  ;;  %v1348_v5 = vmul.u32.u64.high %v411_v43, %v410_v1, %v1347_v4  ;;  %v529_v6 = vshrl.u32 %v528_v0, 30  ;;  %v421_v9 = vadd.s32 1, %v1345_v3 }
 0x170   : > { %v418_v53 = vmul.u32 %v411_v43, %v402_v7  ;;  %vm455_vm9 = vweird.f32 %v1305_v30 }
 0x171   : > { %v530_v8 = vshll.u32 %v529_v6, 30  ;;  %vm420_vm11 = vc.u32 %v1348_v5, %v1344_v2  ;;  %v419_v44 = vadd.s32 %v1344_v2, %v1348_v5  ;;  %v553_v33 = vsub.s32 4, %v529_v6 }
 0x172   : > { %v422_v11 = vsel %vm420_vm11, %v421_v9, %v1345_v3 }
 0x173   : > { %v531_v10 = vsub.s32 %v527_v58, %v530_v8  ;;  %v423_v12 = vadd.s32 %v422_v11, %v418_v53  ;;  %v554_v48 = vsel %vm469_vm14, %v553_v33, %v529_v6 }
 0x174   : > { %v556_v54 = vsel %vm468_vm15, 0, %v554_v48 }
 0x175   : > { %v533_v13 = vsub.s32 0, %v531_v10  ;;  %v424_v14 = vadd.s32 536870912, %v423_v12  ;;  %v560_v63 = vadd.s32 3, %v556_v54 }
 0x177   : > { %v728_v15 = vmin.u32 %v533_v13, %v531_v10  ;;  %v425_v16 = vshrl.u32 %v424_v14, 30  ;;  %v561_v2 = vand.u32 3, %v560_v63 }
 0x179   : > { %v535_v17 = vclz %v728_v15  ;;  %v426_v18 = vshll.u32 %v425_v16, 30  ;;  %v449_v62 = vsub.s32 4, %v425_v16  ;;  %vm566_vm2 = vcmp.eq.s32.totalorder %v561_v2, 2 }
 0x17a   : > { %vm563_vm3 = vcmp.eq.s32.totalorder %v561_v2, 0  ;;  %vm562_vm4 = vcmp.lt.s32.totalorder %v561_v2, 2 }
 0x17b   : > { %v729_v19 = vadd.s32 4294967294, %v535_v17  ;;  %v427_v20 = vsub.s32 %v423_v12, %v426_v18  ;;  %v450_v1 = vsel %vm365_vm0, %v449_v62, %v425_v16 }
 0x17c   : > { %v452_v5 = vsel %vm364_vm1, 0, %v450_v1 }
 0x17d   : > { %vm730_vm12 = vcmp.lt.s32.totalorder %v729_v19, 0  ;;  %v429_v22 = vsub.s32 0, %v427_v20  ;;  %v456_v53 = vadd.s32 3, %v452_v5 }
 0x17e   : > { %v538_v21 = vsel %vm730_vm12, 0, %v729_v19 }
 0x17f   : > { %v539_v24 = vsub.s32 32, %v538_v21  ;;  %v543_v25 = vsub.s32 4294967266, %v538_v21  ;;  %v724_v26 = vmin.u32 %v429_v22, %v427_v20  ;;  %v540_v27 = vshll.u32 %v531_v10, %v538_v21 }
 0x180   : > { %v457_v12 = vand.u32 3, %v456_v53 }
 0x181   : > { %v541_v29 = vshrl.u32 %v523_v23, %v539_v24  ;;  %v544_v34 = vadd.s32 127, %v543_v25  ;;  %v431_v35 = vclz %v724_v26 }
 0x182   : > { %vm462_vm6 = vcmp.eq.s32.totalorder %v457_v12, 2  ;;  %vm459_vm7 = vcmp.eq.s32.totalorder %v457_v12, 0  ;;  %vm458_vm8 = vcmp.lt.s32.totalorder %v457_v12, 2 }
 0x183   : > { %v542_v37 = vor.u32 %v541_v29, %v540_v27  ;;  %v545_v38 = vshll.u32 %v544_v34, 23  ;;  %v725_v39 = vadd.s32 4294967294, %v431_v35 }
 0x185   : > { %v546_v40 = vor.u32 4788187, %v545_v38  ;;  %vm726_vm13 = vcmp.lt.s32.totalorder %v725_v39, 0  ;;  %v549_v42 = vcvt.s32.f32 %v542_v37 }
 0x186   : > { %v434_v43 = vsel %vm726_vm13, 0, %v725_v39 }
 0x187   : > { %v547_v41 = vand.u32 2147483647, %v546_v40  ;;  %v435_v45 = vsub.s32 32, %v434_v43  ;;  %v439_v46 = vsub.s32 4294967266, %v434_v43  ;;  %v436_v47 = vshll.u32 %v427_v20, %v434_v43 }
 0x189   : > { %v550_v32 = vmul.f32 %v549_v42, %v547_v41  ;;  %v437_v50 = vshrl.u32 %v419_v44, %v435_v45  ;;  %v440_v52 = vadd.s32 127, %v439_v46 }
 0x18b   : > { %v551_v55 = vxor.u32 2147483648, %v550_v32  ;;  %v438_v56 = vor.u32 %v437_v50, %v436_v47  ;;  %v441_v49 = vshll.u32 %v440_v52, 23 }
 0x18d   : > { %v552_v57 = vsel %vm469_vm14, %v551_v55, %v550_v32  ;;  %v442_v58 = vor.u32 4788187, %v441_v49  ;;  %v445_v60 = vcvt.s32.f32 %v438_v56 }
 0x18e   : > { %v555_v51 = vsel %vm468_vm15, %v1303_v28, %v552_v57 }
 0x18f   : > { %909 = vcosq.f32 %v555_v51  ;;  %v443_v59 = vand.u32 2147483647, %v442_v58 }
 0x190   : > { %911 = vsinq.f32 %v555_v51 }
 0x191   : > { %v446_v61 = vmul.f32 %v445_v60, %v443_v59 }
 0x193   : > { %v447_v0 = vxor.u32 2147483648, %v446_v61 }
 0x195   : > { %v448_v31 = vsel %vm365_vm0, %v447_v0, %v446_v61 }
 0x196   : > { %v451_v3 = vsel %vm364_vm1, %v1305_v30, %v448_v31 }
 0x197   : > { %913 = vcosq.f32 %v451_v3 }
 0x198   : > { %915 = vsinq.f32 %v451_v3 }
 0x199   : > { %v910_v4 = vpop.eup %909 }
 0x19a   : > { %v912_v6 = vpop.eup %911  ;;  %v567_v7 = vxor.u32 2147483648, %v910_v4 }
 0x19b   : > { %v564_v8 = vxor.u32 2147483648, %v912_v6 }
 0x19c   : > { %v568_v9 = vsel %vm566_vm2, %v567_v7, %v912_v6 }
 0x19d   : > { %v565_v36 = vsel %vm563_vm3, %v910_v4, %v564_v8 }
 0x19e   : > { %v569_v10 = vsel %vm562_vm4, %v565_v36, %v568_v9 }
 0x19f   : > { %v570_v11 = vsel %vm559_vm5, nan, %v569_v10 }
 0x1a0   : > { %572 = vst [vmem:[%s257_s6 + $0x8] sm:$0xff] %v570_v11 }
 0x1a1   : > { %v914_v13 = vpop.eup %913 }
 0x1a2   : > { %v916_v14 = vpop.eup %915  ;;  %v463_v15 = vxor.u32 2147483648, %v914_v13 }
 0x1a3   : > { %v460_v16 = vxor.u32 2147483648, %v916_v14 }
 0x1a4   : > { %v464_v17 = vsel %vm462_vm6, %v463_v15, %v916_v14 }
 0x1a5   : > { %v461_v18 = vsel %vm459_vm7, %v914_v13, %v460_v16 }
 0x1a6   : > { %v465_v28 = vsel %vm458_vm8, %v461_v18, %v464_v17 }
 0x1a7   : > { %v466_v19 = vsel %vm455_vm9, nan, %v465_v28 }
 0x1a8   : > { %571 = vst [vmem:[%s257_s6] sm:$0xff] %v466_v19 }
 0x1a9   : > { %990 = shalt.err (!%p987_p1)
}
 0x1aa   : > { %s991_s7 = scalar_lea.hbm %s1370_s5, 256  ;;  %s995_s21 = scalar_lea.hbm %s1425_s3, 512 }
 0x1ab   : > { %p992_p6 = scmp.ne.s32.totalorder %s1370_s5, %s991_s7  ;;  %p996_p4 = scmp.lt.u32.totalorder %s1370_s5, %s1425_s3 }
 0x1ac   : > { %p997_p8 = scmp.lt.u32.totalorder %s995_s21, %s991_s7  ;;  %p999_p3 = scmp.lt.u32.totalorder %s991_s7, %s1370_s5 }
 0x1ad   : > { %p993_p2 = pnand %p992_p6, %p1436_p12 }
 0x1ae   : > { %p998_p0 = por %p997_p8, %p996_p4 }
 0x1af   : > { %p994_p5 = pneg %p993_p2 }
 0x1b0   : > { %p1000_p13 = por %p999_p3, %p998_p0 }
 0x1b2   : > { %p1001_p7 = pnand %p1000_p13, %p994_p5 }
 0x1b4   : > { %1004 = shalt.err (!%p1001_p7)
}
 0x1b5   : > { %s1076_s6 = smov 128   ;;  %s1077_s23 = smov 8  }
 0x1b6   : > { %836 = dma.vmem_to_hbm [thread:$0]  (%p1436_p12), %s1372_s18, 256, %s1370_s5, %s574_s15, %s1076_s6, %s1076_s6, %s1077_s23  }
 0x1b7 PF: > { %s604_s30 = sand.u32 1, %s1043_s12   ;;  %p1437_p10 = scmp.ne.s32.totalorder %s1431_s27, 0 }
 0x1b8   : > { %p1438_p9 = scmp.ge.s32.totalorder %s1063_s17, 2  ;;  %s605_s10 = scalar_lea.sflag [#allocation4], %s604_s30 }
 0x1ba   : > { %p846_p11 = pnand %p1438_p9, %p1437_p10 }
 0x1bc   : > { %1038 = dma.done.wait (!%p846_p11), %s605_s10, 256  }
 0x1bd   : > { %1040 = vsyncadd (!%p846_p11), %s605_s10, 4294967040  ;;  %s22_s17 = sadd.s32 1, %s1063_s17   ;;  %s1439_s12 = smov %s1047_s13 }
 0x1be   : > { %p19_p1 = scmp.ge.s32.totalorder %s22_s17, 4   ;;  %s1440_s13 = smov %s1051_s14 }
 0x1bf   : > { %s1441_s14 = smov %s1154_s26  ;;  %s1442_s15 = smov %s1059_s16 }
 0x1c0   : > { %s1443_s16 = smov %s1445_s20  ;;  %21 = sbr.rel (!%p19_p1) target bundleno = 8 (0x8), region = 93 }
 0x1c7   :  { %610 = vsyncpa [#allocation3], 1 }
 0x1c8   :  { %612 = vsyncpa [#allocation3 + $0x1], 1 }
 0x1c9   :  { %613 = vsyncpa [#allocation6], 1 }
 0x1ca   :  { %615 = vsyncpa [#allocation6 + $0x1], 1 }
 0x1cb   :  { %616 = vsyncpa [#allocation4], 1 }
 0x1cc   :  { %618 = vsyncpa [#allocation4 + $0x1], 1 }

</bundles_post_ra>
